<compile_context>
chip_gen: v6e
topology: v6e:2x2x1
jax: 0.10.0
libtpu: 0.0.40
codegen_flags: <defaults>
</compile_context>

<pallas_src>
import math
import functools

import jax
import jax.numpy as jnp
from jax import lax
from jax.experimental import pallas as pl
from jax.experimental.pallas import tpu as pltpu


_NEG_INF = float(-0.7 * jnp.finfo(jnp.float32).max)  # large finite mask value


def _pick_block(dim, preferred, align):
    """Largest block <= `preferred` that divides `dim`; full dim if small.

    Keeps the (8, 128) tiling constraint satisfied: when the block is smaller
    than the array dim it is a multiple of `align`.
    """
    if dim <= preferred:
        return dim
    t = (preferred // align) * align
    while t >= align:
        if dim % t == 0:
            return t
        t -= align
    return dim


# ----------------------------- tiled linear --------------------------------
def _matmul_kernel(x_ref, w_ref, b_ref, o_ref, acc_ref, *, cast_bf16):
    @pl.when(pl.program_id(2) == 0)
    def _init():
        acc_ref[...] = jnp.zeros_like(acc_ref)

    x = x_ref[...]
    w = w_ref[...]
    if cast_bf16 and x.dtype == jnp.float32:
        x = x.astype(jnp.bfloat16)
        w = w.astype(jnp.bfloat16)
    acc_ref[...] += jnp.dot(x, w, preferred_element_type=jnp.float32)

    @pl.when(pl.program_id(2) == pl.num_programs(2) - 1)
    def _done():
        o_ref[...] = (acc_ref[...] + b_ref[...]).astype(o_ref.dtype)


def linear(x, w_t, b, *, block_m=256, block_n=256, block_k=512,
           cast_bf16=False):
    """y = x @ w_t + b (w_t is [in, out]); tiled over (M, N, K)."""
    M, K = x.shape
    N = w_t.shape[1]
    tm = _pick_block(M, block_m, 8)
    tn = _pick_block(N, block_n, 128)
    tk = _pick_block(K, block_k, 128)
    kern = functools.partial(_matmul_kernel, cast_bf16=cast_bf16)
    return pl.pallas_call(
        kern,
        out_shape=jax.ShapeDtypeStruct((M, N), x.dtype),
        grid=(M // tm, N // tn, K // tk),
        in_specs=[
            pl.BlockSpec((tm, tk), lambda i, j, k: (i, k)),
            pl.BlockSpec((tk, tn), lambda i, j, k: (k, j)),
            pl.BlockSpec((1, tn), lambda i, j, k: (0, j)),
        ],
        out_specs=pl.BlockSpec((tm, tn), lambda i, j, k: (i, j)),
        scratch_shapes=[pltpu.VMEM((tm, tn), jnp.float32)],
        compiler_params=pltpu.CompilerParams(
            dimension_semantics=("parallel", "parallel", "arbitrary")),
    )(x, w_t, b.reshape(1, N))


# ------------------------------- RoPE kernel --------------------------------
def _rope_kernel(x_ref, cos_ref, sin_ref, o_ref, *, n_heads_rot, head_size):
    hs = head_size
    half = hs // 2
    cos = cos_ref[...]                                   # (tt, hs) f32
    lane = lax.broadcasted_iota(jnp.int32, (1, hs), 1)
    sign = jnp.where(lane < half, -1.0, 1.0).astype(jnp.float32)
    sin_signed = sin_ref[...] * sign                     # hoisted out of loop

    # Rotate every Q and K head (1/sqrt(hs) scale is already folded into wq).
    for h in range(n_heads_rot):
        sl = slice(h * hs, (h + 1) * hs)
        x = x_ref[0, :, sl].astype(jnp.float32)
        rot = pltpu.roll(x, shift=half, axis=1)          # XLU lane rotation
        o_ref[0, :, sl] = (x * cos + rot * sin_signed).astype(o_ref.dtype)


def apply_rope(qkv, cos, sin, *, n_heads_rot, head_size, block_t=512):
    """RoPE over the Q/K lanes of the fused QKV tensor; V is NOT copied."""
    B, T, _ = qkv.shape
    hs = head_size
    qk_width = n_heads_rot * hs
    # Keep (in + out) double-buffered tiles well under the scoped-VMEM default
    # (important on v7x with 64 MiB total VMEM).
    itemsize = jnp.dtype(qkv.dtype).itemsize
    budget = 16 * 1024 * 1024
    cap = max(8, (budget // (4 * qk_width * max(itemsize, 4))) // 8 * 8)
    tt = _pick_block(T, min(block_t, cap), 8)
    kern = functools.partial(_rope_kernel, n_heads_rot=n_heads_rot,
                             head_size=hs)
    return pl.pallas_call(
        kern,
        out_shape=jax.ShapeDtypeStruct((B, T, qk_width), qkv.dtype),
        grid=(B, T // tt),
        in_specs=[
            # Reads only the leading Q/K lanes of the fused QKV tensor.
            pl.BlockSpec((1, tt, qk_width), lambda b, i: (b, i, 0)),
            pl.BlockSpec((tt, hs), lambda b, i: (i, 0)),
            pl.BlockSpec((tt, hs), lambda b, i: (i, 0)),
        ],
        out_specs=pl.BlockSpec((1, tt, qk_width), lambda b, i: (b, i, 0)),
        compiler_params=pltpu.CompilerParams(
            dimension_semantics=("parallel", "parallel")),
    )(qkv, cos, sin)


# --------------------------- flash attention kernel -------------------------
def _flash_attn_kernel(q_ref, k_ref, v_ref, o_ref, m_sc, l_sc, acc_sc,
                       *, block_q, block_k, head_size, group_size,
                       approx_recip, cast_bf16):
    tq, tk, hs, G = block_q, block_k, head_size, group_size
    ki = pl.program_id(3)
    nk = pl.num_programs(3)
    q_start = pl.program_id(2) * tq
    kv_start = ki * tk

    @pl.when(ki == 0)
    def _init():
        m_sc[...] = jnp.full_like(m_sc, _NEG_INF)
        l_sc[...] = jnp.zeros_like(l_sc)
        acc_sc[...] = jnp.zeros_like(acc_sc)

    def _update(apply_mask):
        k = k_ref[0]                                     # (tk, hs)
        v = v_ref[0]                                     # (tk, hs)
        # Stack the GQA group's query heads along sublanes: (G*tq, hs) so the
        # whole group feeds the MXU in a single S matmul and a single p@V.
        if G == 1:
            q = q_ref[0]
        else:
            q = jnp.concatenate(
                [q_ref[0, :, g * hs:(g + 1) * hs] for g in range(G)], axis=0)
        if cast_bf16 and q.dtype == jnp.float32:
            q = q.astype(jnp.bfloat16)
            k = k.astype(jnp.bfloat16)
        s = lax.dot_general(q, k, (((1,), (1,)), ((), ())),
                            preferred_element_type=jnp.float32)  # (G*tq, tk)
        if apply_mask:
            row = q_start + (lax.broadcasted_iota(jnp.int32, (G * tq, tk), 0)
                             % tq)
            col = kv_start + lax.broadcasted_iota(jnp.int32, (G * tq, tk), 1)
            s = jnp.where(col <= row, s, _NEG_INF)
        m_prev = m_sc[...]
        m_new = jnp.maximum(m_prev, jnp.max(s, axis=-1, keepdims=True))
        alpha = jnp.exp(m_prev - m_new)
        p = jnp.exp(s - m_new)
        l_sc[...] = alpha * l_sc[...] + jnp.sum(p, axis=-1, keepdims=True)
        acc_sc[...] = alpha * acc_sc[...] + jnp.dot(
            p.astype(v.dtype), v, preferred_element_type=jnp.float32)
        m_sc[...] = m_new

    # Interior tiles (fully below the diagonal): no mask work at all.
    @pl.when(kv_start + tk - 1 <= q_start)
    def _interior():
        _update(apply_mask=False)

    # Diagonal tiles: need the causal select.  Tiles entirely above the
    # diagonal fall through (and their DMA is skipped via the clamped
    # index_map in the BlockSpecs).
    @pl.when((kv_start <= q_start + tq - 1) & (kv_start + tk - 1 > q_start))
    def _diag():
        _update(apply_mask=True)

    @pl.when(ki == nk - 1)
    def _finalize():
        inv_l = pl.reciprocal(l_sc[...], approx=approx_recip)
        out = acc_sc[...] * inv_l                        # (G*tq, hs) f32
        for g in range(G):
            o_ref[0, :, g * hs:(g + 1) * hs] = (
                out[g * tq:(g + 1) * tq, :].astype(o_ref.dtype))


# --------------------------- parameter preparation --------------------------
def prepare_attention_params(raw, *, n_head, num_kv_heads, head_size,
                             max_seq_len, rope_base=10000.0, rope_scale=1.0):
    """One-time prep: fused QKV weight (1/sqrt(hs) folded into the Q columns),
    fused bias, and the RoPE cos/sin cache.  Done once, not per forward."""
    hs = head_size
    q_scale = 1.0 / math.sqrt(hs)
    w_qkv_t = jnp.concatenate(
        [raw["wq_t"] * q_scale, raw["wk_t"], raw["wv_t"]], axis=1)
    b_qkv = jnp.concatenate([raw["bq"] * q_scale, raw["bk"], raw["bv"]])

    inv_freq = 1.0 / (rope_scale * rope_base **
                      (jnp.arange(0, hs, 2, dtype=jnp.float32) / hs))
    t = jnp.arange(max_seq_len, dtype=jnp.float32)
    freqs = jnp.outer(t, inv_freq)
    emb = jnp.concatenate([freqs, freqs], axis=-1)       # (max_seq_len, hs)
    return {
        "w_qkv_t": w_qkv_t, "b_qkv": b_qkv,
        "wc_t": raw["wc_t"], "bc": raw["bc"],
        "cos": jnp.cos(emb), "sin": jnp.sin(emb),
    }


# ------------------------------- full forward -------------------------------
def attention_forward(q_x, kv_x, prep, *, n_head, num_kv_heads, head_size,
                      block_q=256, block_k=512, cast_bf16=False):
    # block_q/block_k defaults sized for v7x's 64 MiB VMEM; on v5e/v6e
    # (128 MiB) block_q=512 / block_k=1024 further cut K/V HBM refetches.
    B, T, C = q_x.shape
    H, KVH, hs = n_head, num_kv_heads, head_size
    assert H % KVH == 0
    G = H // KVH
    assert hs % 128 == 0, "head_size must be a multiple of the 128-lane width"

    # ---- fused QKV projection (single tiled MXU matmul) --------------------
    if kv_x is None or kv_x is q_x:
        qkv = linear(q_x.reshape(B * T, C), prep["w_qkv_t"], prep["b_qkv"],
                     cast_bf16=cast_bf16)
    else:
        # TODO(synk): cross-attention with kv seq length != q seq length
        # (and the input_pos KV-cache path) is not supported here.
        assert kv_x.shape == q_x.shape
        qc = H * hs
        q = linear(q_x.reshape(B * T, C), prep["w_qkv_t"][:, :qc],
                   prep["b_qkv"][:qc], cast_bf16=cast_bf16)
        kv = linear(kv_x.reshape(B * T, C), prep["w_qkv_t"][:, qc:],
                    prep["b_qkv"][qc:], cast_bf16=cast_bf16)
        qkv = jnp.concatenate([q, kv], axis=-1)
    NF = (H + 2 * KVH) * hs
    qkv = qkv.reshape(B, T, NF)        # free reshape; no head transpose

    # ---- RoPE on q & k only (float32, applied once; scale already in wq) ---
    qk = apply_rope(qkv, prep["cos"][:T], prep["sin"][:T],
                    n_heads_rot=H + KVH, head_size=hs)

    # ---- flash attention: grid (B, kv-head, q tiles, kv tiles) -------------
    tq = _pick_block(T, block_q, 8)
    tk = _pick_block(T, block_k, 8)
    approx_recip = (q_x.dtype == jnp.bfloat16)
    kern = functools.partial(_flash_attn_kernel, block_q=tq, block_k=tk,
                             head_size=hs, group_size=G,
                             approx_recip=approx_recip, cast_bf16=cast_bf16)

    # Clamp the KV block index to the last tile this Q tile needs: Pallas only
    # re-DMAs when the block index changes, so causally-masked tiles cost no
    # HBM bandwidth (pairs with the pl.when compute skip in the kernel).
    def _kv_block(qi, ki):
        return jnp.minimum(ki, (qi * tq + tq - 1) // tk)

    y = pl.pallas_call(
        kern,
        out_shape=jax.ShapeDtypeStruct((B, T, H * hs), q_x.dtype),
        grid=(B, KVH, T // tq, T // tk),
        in_specs=[
            # q: the G heads of group n -> lane offset n*G*hs, width G*hs
            pl.BlockSpec((1, tq, G * hs), lambda b, n, qi, ki: (b, qi, n)),
            # k: kv head n from the RoPE'd q/k tensor (lane offset (H+n)*hs)
            pl.BlockSpec((1, tk, hs),
                         lambda b, n, qi, ki: (b, _kv_block(qi, ki), H + n)),
            # v: kv head n straight from the pre-RoPE fused QKV tensor
            pl.BlockSpec((1, tk, hs),
                         lambda b, n, qi, ki:
                         (b, _kv_block(qi, ki), H + KVH + n)),
        ],
        out_specs=pl.BlockSpec((1, tq, G * hs),
                               lambda b, n, qi, ki: (b, qi, n)),
        scratch_shapes=[
            pltpu.VMEM((G * tq, 1), jnp.float32),    # running max
            pltpu.VMEM((G * tq, 1), jnp.float32),    # running denom
            pltpu.VMEM((G * tq, hs), jnp.float32),   # output accumulator
        ],
        compiler_params=pltpu.CompilerParams(
            dimension_semantics=("parallel", "parallel", "parallel",
                                 "arbitrary")),
    )(qk, qk, qkv)

    # ---- output projection (y is already [B, T, H*hs]; no transpose) -------
    out = linear(y.reshape(B * T, H * hs), prep["wc_t"], prep["bc"],
                 cast_bf16=cast_bf16)
    return out.reshape(B, T, C)
    # TODO(synk): attn_dropout / proj_dropout (p=0 at eval), gradient
    # checkpointing and the flash_attn_2 sliding-window branch are
    # training/runtime-only and intentionally omitted.


# --------------------------- pure-JAX reference -----------------------------
def attention_reference(q_x, kv_x, params, *, n_head, num_kv_heads, head_size,
                        rope_base=10000.0, rope_scale=1.0):
    B, T, C = q_x.shape
    H, KVH, hs = n_head, num_kv_heads, head_size
    G = H // KVH
    if kv_x is None:
        kv_x = q_x
    q = q_x.reshape(B * T, C) @ params["wq_t"] + params["bq"]
    k = kv_x.reshape(B * T, C) @ params["wk_t"] + params["bk"]
    v = kv_x.reshape(B * T, C) @ params["wv_t"] + params["bv"]
    q = q.reshape(B, T, H, hs).transpose(0, 2, 1, 3).astype(jnp.float32)
    k = k.reshape(B, T, KVH, hs).transpose(0, 2, 1, 3).astype(jnp.float32)
    v = v.reshape(B, T, KVH, hs).transpose(0, 2, 1, 3)

    inv_freq = 1.0 / (rope_scale * rope_base **
                      (jnp.arange(0, hs, 2, dtype=jnp.float32) / hs))
    t = jnp.arange(T, dtype=jnp.float32)
    freqs = jnp.outer(t, inv_freq)
    emb = jnp.concatenate([freqs, freqs], axis=-1)
    cos, sin = jnp.cos(emb), jnp.sin(emb)

    def rope(x):
        x1, x2 = x[..., :hs // 2], x[..., hs // 2:]
        rot = jnp.concatenate([-x2, x1], axis=-1)
        return x * cos + rot * sin

    q, k = rope(q), rope(k)
    k = jnp.repeat(k, G, axis=1)
    v = jnp.repeat(v, G, axis=1)

    scores = jnp.einsum("bhqd,bhkd->bhqk", q, k) / math.sqrt(hs)
    mask = jnp.tril(jnp.ones((T, T), dtype=bool))
    scores = jnp.where(mask, scores, -jnp.inf)
    att = jax.nn.softmax(scores, axis=-1)
    y = jnp.einsum("bhqk,bhkd->bhqd", att, v.astype(jnp.float32))
    y = y.transpose(0, 2, 1, 3).reshape(B, T, H * hs)
    out = y.reshape(B * T, H * hs) @ params["wc_t"] + params["bc"]
    return out.reshape(B, T, C).astype(q_x.dtype)


# ----------------------------------- main ------------------------------------
if __name__ == "__main__":
    # small config: n_embd=128, n_head=4, num_kv_heads=2 (GQA), head_size=128
    B, T = 2, 16
    n_embd, n_head, num_kv_heads, head_size = 128, 4, 2, 128

    key = jax.random.PRNGKey(0)
    ks = jax.random.split(key, 10)
    std = 0.02
    params = {
        # torch nn.Linear weight is [out, in]; store pre-transposed [in, out]
        "wq_t": jax.random.normal(ks[0], (n_embd, n_head * head_size), jnp.float32) * std,
        "bq":   jax.random.normal(ks[1], (n_head * head_size,), jnp.float32) * std,
        "wk_t": jax.random.normal(ks[2], (n_embd, num_kv_heads * head_size), jnp.float32) * std,
        "bk":   jax.random.normal(ks[3], (num_kv_heads * head_size,), jnp.float32) * std,
        "wv_t": jax.random.normal(ks[4], (n_embd, num_kv_heads * head_size), jnp.float32) * std,
        "bv":   jax.random.normal(ks[5], (num_kv_heads * head_size,), jnp.float32) * std,
        "wc_t": jax.random.normal(ks[6], (n_head * head_size, n_embd), jnp.float32) * std,
        "bc":   jax.random.normal(ks[7], (n_embd,), jnp.float32) * std,
    }

    q_x = jax.random.normal(ks[8], (B, T, n_embd), jnp.float32)
    kv_x = q_x  # module uses kv_x = q_x when None

    # One-time parameter prep (fused weights, scale folded into wq, RoPE cache)
    prep = prepare_attention_params(
        params, n_head=n_head, num_kv_heads=num_kv_heads,
        head_size=head_size, max_seq_len=T)

    fwd = functools.partial(attention_forward, n_head=n_head,
                            num_kv_heads=num_kv_heads, head_size=head_size)
    out = jax.block_until_ready(fwd(q_x, kv_x, prep))

    ref = attention_reference(q_x, kv_x, params, n_head=n_head,
                              num_kv_heads=num_kv_heads, head_size=head_size)
    assert out.shape == (B, T, n_embd)
    max_err = float(jnp.max(jnp.abs(out - ref)))
    assert jnp.allclose(out, ref, atol=2e-3, rtol=2e-3), \
        f"mismatch vs reference (max abs err {max_err})"
    print("KERNEL_OK")
</pallas_src>

<mosaic_0001>
module attributes {stable_mosaic.version = 11 : i64} {
  func.func @_matmul_kernel(%arg0: i32, %arg1: i32, %arg2: i32, %arg3: memref<32x128xf32, #tpu.memory_space<vmem>>, %arg4: memref<128x256xf32, #tpu.memory_space<vmem>>, %arg5: memref<1x256xf32, #tpu.memory_space<vmem>>, %arg6: memref<32x256xf32, #tpu.memory_space<vmem>>, %arg7: memref<32x256xf32, #tpu.memory_space<vmem>>) attributes {dimension_semantics = [#tpu.dimension_semantics<parallel>, #tpu.dimension_semantics<parallel>, #tpu.dimension_semantics<arbitrary>], iteration_bounds = array<i64: 1, 4, 1>, scalar_prefetch = 0 : i64, scratch_operands = 1 : i64, tpu.core_type = #tpu.core_type<tc>, window_params = [{transform_indices = @transform_0, window_bounds = array<i64: 32, 128>}, {transform_indices = @transform_1, window_bounds = array<i64: 128, 256>}, {transform_indices = @transform_2, window_bounds = array<i64: 1, 256>}, {transform_indices = @transform_3, window_bounds = array<i64: 32, 256>}]} {
    %c0_i32 = arith.constant 0 : i32
    %0 = arith.cmpi eq, %arg2, %c0_i32 : i32
    %1 = arith.extui %0 : i1 to i32
    %c0_i32_0 = arith.constant 0 : i32
    %2 = arith.cmpi ne, %1, %c0_i32_0 : i32
    scf.if %2 {
      %cst_10 = arith.constant 0.000000e+00 : f32
      %12 = vector.broadcast %cst_10 : f32 to vector<32x256xf32>
      %c0_11 = arith.constant 0 : index
      %c0_12 = arith.constant 0 : index
      %13 = vector.load %arg7[%c0_11, %c0_12] : memref<32x256xf32, #tpu.memory_space<vmem>>, vector<32x256xf32>
      tpu.vector_store %arg7[%c0_11, %c0_12], %12 {strides = array<i32>} : memref<32x256xf32, #tpu.memory_space<vmem>>, vector<32x256xf32>,
    } else {
    }
    %c0 = arith.constant 0 : index
    %c0_1 = arith.constant 0 : index
    %3 = vector.load %arg3[%c0, %c0_1] : memref<32x128xf32, #tpu.memory_space<vmem>>, vector<32x128xf32>
    %c0_2 = arith.constant 0 : index
    %c0_3 = arith.constant 0 : index
    %4 = vector.load %arg4[%c0_2, %c0_3] : memref<128x256xf32, #tpu.memory_space<vmem>>, vector<128x256xf32>
    %c0_4 = arith.constant 0 : index
    %c0_5 = arith.constant 0 : index
    %5 = vector.load %arg7[%c0_4, %c0_5] : memref<32x256xf32, #tpu.memory_space<vmem>>, vector<32x256xf32>
    %cst = arith.constant dense<0.000000e+00> : vector<32x256xf32>
    %6 = tpu.matmul %3, %4, %cst {dimension_numbers = #tpu.dot_dimension_numbers<[1], [0], [0], [1], [0, 0, 1, 1], [], []>} : vector<32x128xf32>, vector<128x256xf32>, vector<32x256xf32> -> vector<32x256xf32>
    %7 = arith.addf %5, %6 : vector<32x256xf32>
    %c0_6 = arith.constant 0 : index
    %c0_7 = arith.constant 0 : index
    %8 = vector.load %arg7[%c0_6, %c0_7] : memref<32x256xf32, #tpu.memory_space<vmem>>, vector<32x256xf32>
    tpu.vector_store %arg7[%c0_6, %c0_7], %7 {strides = array<i32>} : memref<32x256xf32, #tpu.memory_space<vmem>>, vector<32x256xf32>,
    %c0_i32_8 = arith.constant 0 : i32
    %9 = arith.cmpi eq, %arg2, %c0_i32_8 : i32
    %10 = arith.extui %9 : i1 to i32
    %c0_i32_9 = arith.constant 0 : i32
    %11 = arith.cmpi ne, %10, %c0_i32_9 : i32
    scf.if %11 {
      %c0_10 = arith.constant 0 : index
      %c0_11 = arith.constant 0 : index
      %12 = vector.load %arg7[%c0_10, %c0_11] : memref<32x256xf32, #tpu.memory_space<vmem>>, vector<32x256xf32>
      %c0_12 = arith.constant 0 : index
      %c0_13 = arith.constant 0 : index
      %13 = vector.load %arg5[%c0_12, %c0_13] : memref<1x256xf32, #tpu.memory_space<vmem>>, vector<1x256xf32>
      %14 = vector.broadcast %13 : vector<1x256xf32> to vector<32x256xf32>
      %15 = arith.addf %12, %14 : vector<32x256xf32>
      %c0_14 = arith.constant 0 : index
      %c0_15 = arith.constant 0 : index
      %16 = vector.load %arg6[%c0_14, %c0_15] : memref<32x256xf32, #tpu.memory_space<vmem>>, vector<32x256xf32>
      tpu.vector_store %arg6[%c0_14, %c0_15], %15 {strides = array<i32>} : memref<32x256xf32, #tpu.memory_space<vmem>>, vector<32x256xf32>,
    } else {
    }
    return
  }
  func.func @transform_0(%arg0: i32, %arg1: i32, %arg2: i32) -> (i32, i32) {
    %c0_i32 = arith.constant 0 : i32
    return %arg0, %arg2 : i32, i32
  }
  func.func @transform_1(%arg0: i32, %arg1: i32, %arg2: i32) -> (i32, i32) {
    %c0_i32 = arith.constant 0 : i32
    return %arg2, %arg1 : i32, i32
  }
  func.func @transform_2(%arg0: i32, %arg1: i32, %arg2: i32) -> (i32, i32) {
    %c0_i32 = arith.constant 0 : i32
    %c0_i32_0 = arith.constant 0 : i32
    return %c0_i32, %arg1 : i32, i32
  }
  func.func @transform_3(%arg0: i32, %arg1: i32, %arg2: i32) -> (i32, i32) {
    %c0_i32 = arith.constant 0 : i32
    return %arg0, %arg1 : i32, i32
  }
}

</mosaic_0001>

<bundles_post_ra>
// kernel: tpu_custom_call.1
= control target key start
LH: loop header
LB: loop body
LE: loop exit
PB: predicated region body
PF: predicated region fallthrough
CT: control target
= control target key end

     0   :  { %8 = vsyncpa [#allocation4], 0  ;;  %s1206_s0 = inlined_call_operand.hbm [shape: f32[32,128], index: 0, kind: input, shape index: {}]   ;;  %s1207_s1 = inlined_call_operand.hbm [shape: f32[128,1024], index: 1, kind: input, shape index: {}]   ;;  %s1208_s2 = inlined_call_operand.hbm [shape: f32[1,1024], index: 2, kind: input, shape index: {}]   ;;  %s1209_s3 = inlined_call_operand.hbm [shape: f32[32,1024], index: 3, kind: output, shape index: {}]  }
   0x1   :  { %9 = vsyncpa [#allocation7], 0 }
   0x2   :  { %11 = vsyncpa [#allocation7 + $0x1], 0 }
   0x3   :  { %12 = vsyncpa [#allocation5], 0 }
   0x4   :  { %14 = vsyncpa [#allocation5 + $0x1], 0  ;;  %s969_s12 = smov 0   ;;  %s971_s13 = smov 0  }
   0x5   :  { %s973_s14 = smov 0   ;;  %s975_s15 = smov 0  }
   0x6   :  { %s977_s16 = smov 0   ;;  %s979_s17 = smov 0  }
   0x7 LB: > { %s35_s18 = sadd.s32 1, %s930_s16  ;;  %s76_s19 = sadd.s32 1, %s922_s14  ;;  %s934_s17 = sphi %s979_s17, %s20_s17   ;;  %s930_s16 = sphi %s977_s16, %s1228_s16   ;;  %s926_s15 = sphi %s975_s15, %s1227_s15   ;;  %s922_s14 = sphi %s973_s14, %s1226_s14   ;;  %s918_s13 = sphi %s971_s13, %s1225_s13   ;;  %s914_s12 = sphi %s969_s12, %s1224_s12  }
   0x8   : > { %p37_p0 = scmp.ge.s32.totalorder %s35_s18, 4  ;;  %p83_p1 = scmp.ne.s32.totalorder %s922_s14, %s918_s13 }
   0x9   : > { %p84_p2 = scmp.eq.s32.totalorder %s934_s17, 0  ;;  %p707_p4 = scmp.lt.s32.totalorder %s934_s17, 4 }
   0xa   : > { %s1230_s18 = smov (%p37_p0, %s35_s18), 0  ;;  %s184_s21 = sand.u32 1, %s934_s17  }
   0xb   : > { %p85_p3 = por %p84_p2, %p83_p1  ;;  %s72_s20 = ssub.s32 %s930_s16, %s1230_s18 }
   0xc   : > { %p74_p5 = scmp.eq.s32.totalorder %s72_s20, 0  ;;  %s186_s22 = sand.u32 1, %s922_s14  }
   0xd   : > { %s646_s23 = sshll.u32 %s930_s16, 8  ;;  %s630_s25 = sshll.u32 %s186_s22, 8 }
   0xe   : > { %s1016_s24 = scalar_select %p74_p5, %s922_s14, %s76_s19  }
   0xf   : > { %s197_s28 = scalar_lea.hbm %s1207_s1, %s646_s23  ;;  %p1023_p6 = pnand %p707_p4, %p85_p3 }
  0x10   : > { %s188_s30 = scalar_lea.vmem [#allocation6], %s630_s25  ;;  %s1027_s5 = scalar_lea.sflag [#allocation7], %s184_s21 }
  0x11   : > { %s198_s4 = sshll.u32 %s188_s30, 4  ;;  %p1211_p7 = pneg %p1023_p6  ;;  %s199_s4 = int_to_ptr.vmem [resolvable:$true] %s198_s4 }
  0x12   : > { %s781_s6 = scalar_lea.vmem %s199_s4, 4096  ;;  %s936_s7 = smov [#allocation6]  }
  0x13   : > { %p782_p8 = scmp.ne.s32.totalorder %s199_s4, %s781_s6  ;;  %s786_s8 = sshll.u32 %s936_s7, 4  ;;  %s787_s8 = int_to_ptr.vmem [resolvable:$false] %s786_s8 }
  0x14   : > { %s788_s9 = scalar_lea.vmem %s787_s8, 8192  ;;  %p789_p11 = scmp.lt.s32.totalorder %s199_s4, %s787_s8 }
  0x15   : > { %p784_p9 = pnand %p782_p8, %p1211_p7  ;;  %p790_p12 = scmp.lt.s32.totalorder %s788_s9, %s781_s6 }
  0x17   : > { %p785_p10 = pneg %p784_p9  ;;  %p791_p13 = por %p790_p12, %p789_p11 }
  0x19   : > { %p792_p0 = pnand %p791_p13, %p785_p10 }
  0x1b   : > { %795 = shalt.err (!%p792_p0)
}
  0x1c   : > { %s937_s10 = smov 1024   ;;  %s938_s11 = smov 256  }
  0x1d   : > { %s939_s19 = smov 16   ;;  %s1038_s20 = sadd.s32 4294967295, %s934_s17  }
  0x1e   : > { %698 = dma.hbm_to_vmem [thread:$0]  (!%p1023_p6), %s197_s28, 4096, %s199_s4, %s1027_s5, %s937_s10, %s938_s11, %s939_s19  }
  0x1f   : > { %s626_s21 = sadd.s32 4294967294, %s934_s17   ;;  %p89_p2 = scmp.ne.s32.totalorder %s918_s13, %s914_s12 }
  0x20   : > { %p1210_p3 = scmp.eq.s32.totalorder %s1038_s20, 0  ;;  %p141_p4 = scmp.eq.s32.totalorder %s1038_s20, 3 }
  0x21   : > { %p147_p5 = scmp.eq.s32.totalorder %s626_s21, 3  ;;  %p627_p9 = scmp.ge.s32.totalorder %s934_s17, 1 }
  0x22   : > { %p1047_p8 = por %p1210_p3, %p89_p2  ;;  %p1055_p10 = por %p141_p4, %p83_p1 }
  0x23   : > { %p1059_p11 = por %p147_p5, %p89_p2  ;;  %p154_p12 = scmp.lt.s32.totalorder %s934_s17, 5 }
  0x24   : > { %s1215_s25 = scalar_select %p1055_p10, 1, 0 }
  0x25   : > { %s1216_s26 = scalar_select %p1059_p11, 1, 0 }
  0x26   : > { %p1064_p13 = pnand %p627_p9, %p154_p12  ;;  %s940_s28 = smov [#allocation3]  }
  0x27   : > { %s170_s30 = sshll.u32 %s940_s28, 4  ;;  %s633_s4 = sshll.u32 %s186_s22, 1  ;;  %s171_s30 = int_to_ptr.vmem [resolvable:$true] %s170_s30 }
  0x28   : > { %p691_p0 = pneg %p1064_p13  ;;  %s647_s6 = sshll.u32 %s930_s16, 5 }
  0x29   : > { %s1082_s10 = scalar_lea.hbm %s1208_s2, %s647_s6  ;;  %s212_s11 = scalar_lea.vmem [#allocation8], %s633_s4 }
  0x2a   : > { %p1075_p1 = pnand %p691_p0, %p1210_p3  ;;  %s220_s19 = sshll.u32 %s212_s11, 4  ;;  %s221_s19 = int_to_ptr.vmem [resolvable:$true] %s220_s19 }
  0x2b   : > { %s807_s21 = scalar_lea.vmem %s171_s30, 512  ;;  %p815_p12 = scmp.lt.s32.totalorder %s171_s30, %s171_s30 }
  0x2c   : > { %p798_p2 = pneg %p1075_p1  ;;  %p808_p4 = scmp.ne.s32.totalorder %s171_s30, %s807_s21 }
  0x2d   : > { %p816_p0 = scmp.lt.s32.totalorder %s807_s21, %s807_s21 }
  0x2e   : > { %p810_p5 = pnand %p808_p4, %p798_p2 }
  0x2f   : > { %p817_p3 = por %p816_p0, %p815_p12 }
  0x30   : > { %p811_p9 = pneg %p810_p5 }
  0x32   : > { %p818_p7 = pnand %p817_p3, %p811_p9 }
  0x34   : > { %821 = shalt.err (!%p818_p7)
}
  0x35   : > { %s941_s22 = smov 128   ;;  %s942_s28 = smov 8  }
  0x36   : > { %694 = dma.hbm_to_vmem [thread:$0]  (!%p1075_p1), %s1206_s0, 512, %s171_s30, [#allocation4], %s941_s22, %s941_s22, %s942_s28  }
  0x37   : > { %s835_s8 = scalar_lea.vmem %s221_s19, 32  ;;  %p1219_p10 = pneg %p1023_p6 }
  0x38   : > { %p836_p11 = scmp.ne.s32.totalorder %s221_s19, %s835_s8  ;;  %s943_s9 = smov [#allocation8]  }
  0x39   : > { %s840_s11 = sshll.u32 %s943_s9, 4  ;;  %s841_s11 = int_to_ptr.vmem [resolvable:$false] %s840_s11 }
  0x3a   : > { %p838_p2 = pnand %p836_p11, %p1219_p10  ;;  %s842_s21 = scalar_lea.vmem %s841_s11, 64 }
  0x3b   : > { %p843_p7 = scmp.lt.s32.totalorder %s221_s19, %s841_s11  ;;  %p844_p3 = scmp.lt.s32.totalorder %s842_s21, %s835_s8 }
  0x3c   : > { %p839_p4 = pneg %p838_p2 }
  0x3d   : > { %p845_p5 = por %p844_p3, %p843_p7 }
  0x3f   : > { %p846_p9 = pnand %p845_p5, %p839_p4 }
  0x41   : > { %849 = shalt.err (!%p846_p9)
}
  0x42   : > { %701 = dma.hbm_to_vmem [thread:$0]  (!%p1023_p6), %s1082_s10, 32, %s221_s19, %s1027_s5  }
  0x43   : > { %229 = sbr.rel (%p1064_p13) target bundleno = 327 (0x147), region = 32  ;;  %p1220_p10 = scmp.eq.s32.totalorder (!%p1064_p13), %s1038_s20, 0 }
  0x48   : > { %901 = dma.done.wait (%p1220_p10), [#allocation4], 512   ;;  %p1221_p11 = pmov %p1220_p10 }
  0x49   : > { %s235_s30 = sand.u32 1, %s1038_s20   ;;  %s1106_s7 = sand.u32 1, %s918_s13  }
  0x4a   : > { %903 = vsyncadd (%p1221_p11), [#allocation4], 4294966784  ;;  %s638_s29 = sshll.u32 %s1106_s7, 8  ;;  %s236_s22 = scalar_lea.sflag [#allocation7], %s235_s30 }
  0x4b   : > { %s1109_s28 = scalar_lea.vmem [#allocation6], %s638_s29 }
  0x4c   : > { %905 = dma.done.wait (%p1047_p8), %s236_s22, 4128  }
  0x4d   : > { %907 = vsyncadd (%p1047_p8), %s236_s22, 4294963168  ;;  %v944_v0 = vmov 0.0   ;;  %v329_v1 = vld [vmem:[%s1109_s28 + $0xf8] sm:$0xff]  ;;  %v328_v2 = vld [vmem:[%s1109_s28 + $0xf0] sm:$0xff]  ;;  %v456_v37 = vlaneseq  ;;  %s639_s5 = sshll.u32 %s1106_s7, 1  ;;  %s640_s23 = sshll.u32 %s1106_s7, 6 }
  0x4e   : > { %402 = vmatprep.mubr.f32.mxu0 %v944_v0  ;;  %414 = vmatprep.mubr.f32.mxu1 %v944_v0  ;;  %v327_v3 = vld [vmem:[%s1109_s28 + $0xe8] sm:$0xff]  ;;  %v326_v4 = vld [vmem:[%s1109_s28 + $0xe0] sm:$0xff]  ;;  %v325_v5 = vld [vmem:[%s1109_s28 + $0xd8] sm:$0xff]  ;;  %s248_s20 = scalar_lea.vmem [#allocation8], %s639_s5  ;;  %s275_s27 = scalar_lea.vmem [#allocation9], %s640_s23 }
  0x4f   : > { %338 = vmatprep.subr.mxu0 %v329_v1  ;;  %649 = vmatprep.subr.mxu1 %v329_v1  ;;  %v324_v6 = vld [vmem:[%s1109_s28 + $0xd0] sm:$0xff]  ;;  %v323_v7 = vld [vmem:[%s1109_s28 + $0xc8] sm:$0xff]  ;;  %v322_v8 = vld [vmem:[%s1109_s28 + $0xc0] sm:$0xff]  ;;  %v457_v38 = vshrl.u32 %v456_v37, 7  ;;  %s499_s10 = sshll.u32 %s275_s27, 4  ;;  %s648_s19 = sshll.u32 %s926_s15, 8  ;;  %s1154_s10 = int_to_ptr.vmem [resolvable:$true] %s499_s10 }
  0x50   : > { %339 = vmatpush1.msra.mxu0 %v328_v2  ;;  %665 = vmatpush1.msra.mxu1 %v328_v2  ;;  %v321_v9 = vld [vmem:[%s1109_s28 + $0xb8] sm:$0xff]  ;;  %v320_v10 = vld [vmem:[%s1109_s28 + $0xb0] sm:$0xff]  ;;  %v319_v11 = vld [vmem:[%s1109_s28 + $0xa8] sm:$0xff]  ;;  %s1159_s8 = scalar_lea.hbm %s1209_s3, %s648_s19  ;;  %s483_s15 = scalar_lea.sflag [#allocation5], %s1106_s7 }
  0x51   : > { %340 = vmatprep.subr.mxu0 %v327_v3  ;;  %650 = vmatprep.subr.mxu1 %v327_v3  ;;  %v318_v12 = vld [vmem:[%s1109_s28 + $0xa0] sm:$0xff]  ;;  %v317_v13 = vld [vmem:[%s1109_s28 + $0x98] sm:$0xff]  ;;  %v316_v14 = vld [vmem:[%s1109_s28 + $0x90] sm:$0xff]  ;;  %v458_v39 = vsub.s32 0, %v457_v38  ;;  %v462_v41 = vsub.s32 1, %v457_v38  ;;  %s850_s9 = scalar_lea.vmem %s1154_s10, 1024 }
  0x52   : > { %341 = vmatpush1.msra.mxu0 %v326_v4  ;;  %666 = vmatpush1.msra.mxu1 %v326_v4  ;;  %v315_v15 = vld [vmem:[%s1109_s28 + $0x88] sm:$0xff]  ;;  %v314_v16 = vld [vmem:[%s1109_s28 + $0x80] sm:$0xff]  ;;  %v313_v17 = vld [vmem:[%s1109_s28 + $0x78] sm:$0xff]  ;;  %p851_p6 = scmp.ne.s32.totalorder %s1154_s10, %s850_s9  ;;  %p1222_p8 = scmp.ne.s32.totalorder %s1215_s25, 0 }
  0x53   : > { %342 = vmatprep.subr.mxu0 %v325_v5  ;;  %651 = vmatprep.subr.mxu1 %v325_v5  ;;  %v312_v18 = vld [vmem:[%s1109_s28 + $0x70] sm:$0xff]  ;;  %v311_v19 = vld [vmem:[%s1109_s28 + $0x68] sm:$0xff]  ;;  %v310_v20 = vld [vmem:[%s1109_s28 + $0x60] sm:$0xff]  ;;  %s945_s11 = smov [#allocation9]  }
  0x54   : > { %343 = vmatpush1.msra.mxu0 %v324_v6  ;;  %667 = vmatpush1.msra.mxu1 %v324_v6  ;;  %v309_v21 = vld [vmem:[%s1109_s28 + $0x58] sm:$0xff]  ;;  %v308_v22 = vld [vmem:[%s1109_s28 + $0x50] sm:$0xff]  ;;  %v307_v23 = vld [vmem:[%s1109_s28 + $0x48] sm:$0xff]  ;;  %p852_p13 = pnand %p851_p6, %p1222_p8  ;;  %s854_s21 = sshll.u32 %s945_s11, 4  ;;  %s855_s21 = int_to_ptr.vmem [resolvable:$false] %s854_s21 }
  0x55   : > { %344 = vmatprep.subr.mxu0 %v323_v7  ;;  %652 = vmatprep.subr.mxu1 %v323_v7  ;;  %v306_v24 = vld [vmem:[%s1109_s28 + $0x40] sm:$0xff]  ;;  %v305_v25 = vld [vmem:[%s1109_s28 + $0x38] sm:$0xff]  ;;  %v304_v26 = vld [vmem:[%s1109_s28 + $0x30] sm:$0xff]  ;;  %s856_s30 = scalar_lea.vmem %s855_s21, 2048  ;;  %p857_p12 = scmp.lt.s32.totalorder %s1154_s10, %s855_s21 }
  0x56   : > { %345 = vmatpush1.msra.mxu0 %v322_v8  ;;  %668 = vmatpush1.msra.mxu1 %v322_v8  ;;  %v303_v27 = vld [vmem:[%s1109_s28 + $0x28] sm:$0xff]  ;;  %v302_v28 = vld [vmem:[%s1109_s28 + $0x20] sm:$0xff]  ;;  %v301_v29 = vld [vmem:[%s1109_s28 + $0x18] sm:$0xff]  ;;  %p853_p1 = pneg %p852_p13  ;;  %p858_p0 = scmp.lt.s32.totalorder %s856_s30, %s850_s9 }
  0x57   : > { %346 = vmatprep.subr.mxu0 %v321_v9  ;;  %653 = vmatprep.subr.mxu1 %v321_v9  ;;  %v300_v30 = vld [vmem:[%s1109_s28 + $0x10] sm:$0xff]  ;;  %v299_v31 = vld [vmem:[%s1109_s28 + $0x8] sm:$0xff]  ;;  %v298_v32 = vld [vmem:[%s1109_s28] sm:$0xff] }
  0x58   : > { %347 = vmatpush1.msra.mxu0 %v320_v10  ;;  %669 = vmatpush1.msra.mxu1 %v320_v10  ;;  %v294_v33 = vld [vmem:[#allocation3] sm:$0xff]  ;;  %v296_v34 = vld [vmem:[#allocation3 + $0x10] sm:$0xff]  ;;  %v295_v35 = vld [vmem:[#allocation3 + $0x8] sm:$0xff]  ;;  %p859_p2 = por %p858_p0, %p857_p12 }
  0x59   : > { %348 = vmatprep.subr.mxu0 %v319_v11  ;;  %654 = vmatprep.subr.mxu1 %v319_v11  ;;  %v297_v36 = vld [vmem:[#allocation3 + $0x18] sm:$0xff]  ;;  %v454_v40 = vld [vmem:[%s248_s20] sm:$0x3] }
  0x5a   : > { %349 = vmatpush1.msra.mxu0 %v318_v12  ;;  %670 = vmatpush1.msra.mxu1 %v318_v12  ;;  %v459_v42 = vrot.slane %v454_v40, %v458_v39  ;;  %v463_v43 = vrot.slane %v454_v40, %v462_v41  ;;  %p860_p4 = pnand %p859_p2, %p853_p1 }
  0x5b   : > { %350 = vmatprep.subr.mxu0 %v317_v13  ;;  %655 = vmatprep.subr.mxu1 %v317_v13 }
  0x5c   : > { %351 = vmatpush1.msra.mxu0 %v316_v14  ;;  %671 = vmatpush1.msra.mxu1 %v316_v14 }
  0x5d   : > { %352 = vmatprep.subr.mxu0 %v315_v15  ;;  %656 = vmatprep.subr.mxu1 %v315_v15 }
  0x5e   : > { %353 = vmatpush1.msra.mxu0 %v314_v16  ;;  %672 = vmatpush1.msra.mxu1 %v314_v16 }
  0x5f   : > { %354 = vmatprep.subr.mxu0 %v313_v17  ;;  %657 = vmatprep.subr.mxu1 %v313_v17 }
  0x60   : > { %355 = vmatpush1.msra.mxu0 %v312_v18  ;;  %673 = vmatpush1.msra.mxu1 %v312_v18 }
  0x61   : > { %356 = vmatprep.subr.mxu0 %v311_v19  ;;  %658 = vmatprep.subr.mxu1 %v311_v19 }
  0x62   : > { %357 = vmatpush1.msra.mxu0 %v310_v20  ;;  %674 = vmatpush1.msra.mxu1 %v310_v20 }
  0x63   : > { %358 = vmatprep.subr.mxu0 %v309_v21  ;;  %659 = vmatprep.subr.mxu1 %v309_v21 }
  0x64   : > { %359 = vmatpush1.msra.mxu0 %v308_v22  ;;  %675 = vmatpush1.msra.mxu1 %v308_v22 }
  0x65   : > { %360 = vmatprep.subr.mxu0 %v307_v23  ;;  %660 = vmatprep.subr.mxu1 %v307_v23 }
  0x66   : > { %361 = vmatpush1.msra.mxu0 %v306_v24  ;;  %676 = vmatpush1.msra.mxu1 %v306_v24 }
  0x67   : > { %362 = vmatprep.subr.mxu0 %v305_v25  ;;  %661 = vmatprep.subr.mxu1 %v305_v25 }
  0x68   : > { %363 = vmatpush1.msra.mxu0 %v304_v26  ;;  %677 = vmatpush1.msra.mxu1 %v304_v26 }
  0x69   : > { %364 = vmatprep.subr.mxu0 %v303_v27  ;;  %662 = vmatprep.subr.mxu1 %v303_v27 }
  0x6a   : > { %365 = vmatpush1.msra.mxu0 %v302_v28  ;;  %678 = vmatpush1.msra.mxu1 %v302_v28 }
  0x6b   : > { %366 = vmatprep.subr.mxu0 %v301_v29  ;;  %663 = vmatprep.subr.mxu1 %v301_v29 }
  0x6c   : > { %367 = vmatpush1.msra.mxu0 %v300_v30  ;;  %679 = vmatpush1.msra.mxu1 %v300_v30 }
  0x6d   : > { %368 = vmatprep.subr.mxu0 %v299_v31  ;;  %664 = vmatprep.subr.mxu1 %v299_v31 }
  0x6e   : > { %369 = vmatpush1.msra.mxu0 %v298_v32  ;;  %680 = vmatpush1.msra.mxu1 %v298_v32 }
  0x6f   : > { %403 = vmatmul.mubr.f32.vlgmr.msra.gmra.mxu0 %v294_v33  ;;  %415 = vmatmul.mubr.f32.vlgmr.msra.gmra.mxu1 %v296_v34 }
  0x70   : > { %408 = vmatprep.mubr.f32.mxu0 %v944_v0  ;;  %420 = vmatprep.mubr.f32.mxu1 %v944_v0 }
  0x73   : > { %409 = vmatmul.mubr.f32.gmra.mxu0 %v295_v35  ;;  %421 = vmatmul.mubr.f32.gmra.mxu1 %v297_v36 }
 0x12f   : > { %v404_v44 = vpop.f32.mrf.mxu0  ;;  %v416_v45 = vpop.f32.mrf.mxu1 }
 0x130   : > { %v466_v46 = vadd.f32 %v459_v42, %v404_v44  ;;  %v470_v47 = vadd.f32 %v459_v42, %v416_v45 }
 0x131   : > { %v406_v48 = vpop.f32.mrf.mxu0  ;;  %v418_v49 = vpop.f32.mrf.mxu1 }
 0x132   : > { %474 = vst [vmem:[%s275_s27] sm:$0xff] %v466_v46  ;;  %478 = vst [vmem:[%s275_s27 + $0x20] sm:$0xff] %v470_v47  ;;  %v467_v50 = vadd.f32 %v463_v43, %v406_v48  ;;  %v471_v51 = vadd.f32 %v463_v43, %v418_v49 }
 0x133   : > { %v410_v52 = vpop.f32.mrf.mxu0  ;;  %v422_v53 = vpop.f32.mrf.mxu1 }
 0x134   : > { %475 = vst [vmem:[%s275_s27 + $0x8] sm:$0xff] %v467_v50  ;;  %479 = vst [vmem:[%s275_s27 + $0x28] sm:$0xff] %v471_v51  ;;  %v468_v54 = vadd.f32 %v459_v42, %v410_v52  ;;  %v472_v55 = vadd.f32 %v459_v42, %v422_v53 }
 0x135   : > { %v412_v56 = vpop.f32.mrf.mxu0  ;;  %v424_v57 = vpop.f32.mrf.mxu1 }
 0x136   : > { %476 = vst [vmem:[%s275_s27 + $0x10] sm:$0xff] %v468_v54  ;;  %480 = vst [vmem:[%s275_s27 + $0x30] sm:$0xff] %v472_v55  ;;  %v469_v58 = vadd.f32 %v463_v43, %v412_v56  ;;  %v473_v59 = vadd.f32 %v463_v43, %v424_v57 }
 0x138   : > { %477 = vst [vmem:[%s275_s27 + $0x18] sm:$0xff] %v469_v58  ;;  %481 = vst [vmem:[%s275_s27 + $0x38] sm:$0xff] %v473_v59 }
 0x139   : > { %863 = shalt.err (!%p860_p4)
}
 0x13a   : > { %s864_s29 = scalar_lea.hbm %s1159_s8, 1024  ;;  %s868_s5 = scalar_lea.hbm %s1209_s3, 4096 }
 0x13b   : > { %p865_p7 = scmp.ne.s32.totalorder %s1159_s8, %s864_s29  ;;  %p869_p9 = scmp.lt.s32.totalorder %s1159_s8, %s1209_s3 }
 0x13c   : > { %p870_p10 = scmp.lt.s32.totalorder %s868_s5, %s864_s29 }
 0x13d   : > { %p866_p3 = pnand %p865_p7, %p1222_p8 }
 0x13e   : > { %p871_p11 = por %p870_p10, %p869_p9 }
 0x13f   : > { %p867_p5 = pneg %p866_p3 }
 0x141   : > { %p872_p6 = pnand %p871_p11, %p867_p5 }
 0x143   : > { %875 = shalt.err (!%p872_p6)
}
 0x144   : > { %s946_s27 = smov 256   ;;  %s947_s19 = smov 1024  }
 0x145   : > { %s948_s6 = smov 16  }
 0x146   : > { %689 = dma.vmem_to_hbm [thread:$0]  (%p1222_p8), %s1154_s10, 1024, %s1159_s8, %s483_s15, %s946_s27, %s947_s19, %s948_s6  }
 0x147 PF: > { %p709_p13 = scmp.ge.s32.totalorder %s934_s17, 2  ;;  %s514_s4 = sand.u32 1, %s914_s12  }
 0x148   : > { %p1223_p1 = scmp.ne.s32.totalorder %s1216_s26, 0  ;;  %s515_s9 = scalar_lea.sflag [#allocation5], %s514_s4 }
 0x14a   : > { %p703_p12 = pnand %p709_p13, %p1223_p1 }
 0x14c   : > { %p704_p0 = pneg %p703_p12 }
 0x14e   : > { %909 = dma.done.wait (%p704_p0), %s515_s9, 1024  }
 0x14f   : > { %911 = vsyncadd (%p704_p0), %s515_s9, 4294966272  ;;  %s20_s17 = sadd.s32 1, %s934_s17   ;;  %s1224_s12 = smov %s918_s13 }
 0x150   : > { %p17_p2 = scmp.ge.s32.totalorder %s20_s17, 6   ;;  %s1225_s13 = smov %s922_s14 }
 0x151   : > { %s1226_s14 = smov %s1016_s24  ;;  %s1227_s15 = smov %s930_s16 }
 0x152   : > { %s1228_s16 = smov %s1230_s18  ;;  %19 = sbr.rel (!%p17_p2) target bundleno = 7 (0x7), region = 102 }
 0x157   :  { %520 = vsyncpa [#allocation4], 1 }
 0x158   :  { %522 = vsyncpa [#allocation4 + $0x1], 1 }
 0x159   :  { %523 = vsyncpa [#allocation7], 1 }
 0x15a   :  { %525 = vsyncpa [#allocation7 + $0x1], 1 }
 0x15b   :  { %526 = vsyncpa [#allocation5], 1 }
 0x15c   :  { %528 = vsyncpa [#allocation5 + $0x1], 1 }

</bundles_post_ra>
